<compile_context>
chip_gen: v5e
topology: v5e:2x2
jax: 0.10.0
libtpu: 0.0.40
codegen_flags: <defaults>
</compile_context>

<pallas_src>
import numpy as np
import jax
import jax.numpy as jnp
from jax.experimental import pallas as pl
from jax.experimental.pallas import tpu as pltpu

# ------------------------- model hyper-parameters ---------------------------
VOCAB_SIZE = 50
VOCAB_PAD = 128            # vocab rows padded to a full lane tile for the one-hot gather
OUTPUT_SIZE = 2
EMBEDDING_DIM = 32         # forward() does z.view(T, B, 32), so emb dim must be 32
HIDDEN_DIM = 32
GATES = 4 * HIDDEN_DIM     # 128 -> exactly one lane tile
FC1_PAD = 128              # fc1 (10 units) padded to lane width
SEQ_LEN = 8
BATCH = 8
# TODO(synk): nn.Dropout(drop_prob) is identity in eval mode; training-mode
#             stochastic dropout is not implemented here.


# ------------------------------ Pallas kernel -------------------------------
def make_lstm_fc_kernel(T, B, H, roll_shifts):
    """Single-invocation kernel: fused embedding gather + LSTM recurrence + FC head."""
    sh_f, sh_o, sh_g = roll_shifts    # lane shifts bringing the f / o / g quarters to lanes [0:H]
    TB = T * B
    G = 4 * H

    def kernel(ids_ref, embg_ref, whh_ref, w1_ref, b1_ref, w2_ref, b2_ref, out_ref):
        # ---- fused embedding gather + input projection (one MXU matmul) ----
        # one-hot(ids) @ (emb @ W_ih^T + b) selects  z_t @ W_ih^T + b  row-exactly.
        ids = ids_ref[...]                                            # (TB, 1) int32
        lane = jax.lax.broadcasted_iota(jnp.int32, (TB, VOCAB_PAD), 1)
        onehot = (lane == ids).astype(jnp.float32)                    # (TB, VPAD)
        gates_x = jnp.dot(onehot, embg_ref[...],
                          preferred_element_type=jnp.float32)         # (TB, 4H)

        whh = whh_ref[...]                                            # (4H, 4H); rows [H:] are zero

        # Wide state: (B, 4H) tiles, live data in lanes [0:H], rest bounded junk.
        h = jnp.zeros((B, G), jnp.float32)
        c = jnp.zeros((B, G), jnp.float32)

        # Fully unrolled recurrence (T is a small compile-time constant).
        for t in range(T):
            g_x = gates_x[t * B:(t + 1) * B, :]                       # (B, 4H), sublane-aligned
            # zero rows [H:] of whh annihilate the junk lanes of the wide h.
            gates = g_x + jnp.dot(h, whh, preferred_element_type=jnp.float32)

            # Single full-width tanh; i/f/o preactivations were pre-scaled by 0.5
            # on the host, so sigmoid = 0.5*(tanh + 1).  Quarters: [i | f | o | g].
            th = jnp.tanh(gates)                                      # (B, 4H)
            sg = 0.5 * th + 0.5                                       # [sig(i)|sig(f)|sig(o)| . ]

            # Realign gate quarters to lanes [0:H] on the XLU (no masked lane slices).
            f_al = pltpu.roll(sg, sh_f, axis=1)
            o_al = pltpu.roll(sg, sh_o, axis=1)
            g_al = pltpu.roll(th, sh_g, axis=1)

            c = f_al * c + sg * g_al                                  # lanes [0:H]: f*c + i*g
            h = o_al * jnp.tanh(c)                                    # lanes [0:H]: o*tanh(c)

        # ---- head: fc2(tanh(fc1(h_T))), dropout = identity in eval mode ----
        # w1 rows [H:] are zero, so the junk lanes of h never leak in.
        z1 = jnp.tanh(jnp.dot(h, w1_ref[...],
                              preferred_element_type=jnp.float32) + b1_ref[...])
        out_ref[...] = (jnp.dot(z1, w2_ref[...],
                                preferred_element_type=jnp.float32)
                        + b2_ref[...]).astype(out_ref.dtype)

    return kernel


def probe_roll_shifts():
    """Determine pltpu.roll's lane-rotation direction once on hardware and
    return the shifts that bring the f / o / g gate quarters to lanes [0:H]."""
    x = jnp.tile(jnp.arange(128, dtype=jnp.float32)[None, :], (8, 1))

    def kern(x_ref, o_ref):
        o_ref[...] = pltpu.roll(x_ref[...], 32, axis=1)

    vmem = pl.BlockSpec(memory_space=pltpu.MemorySpace.VMEM)
    y = pl.pallas_call(kern, out_shape=jax.ShapeDtypeStruct((8, 128), jnp.float32),
                       in_specs=[vmem], out_specs=vmem)(x)
    first = int(jax.device_get(y)[0, 0])
    H = HIDDEN_DIM
    if first == 96:        # jnp.roll convention: element j -> j + shift
        return (128 - H, 128 - 2 * H, 128 - 3 * H)   # f(q1)->q0, o(q2)->q0, g(q3)->q0
    if first == 32:        # opposite convention: out[i] = in[i + shift]
        return (H, 2 * H, 3 * H)
    raise RuntimeError(f"unexpected pltpu.roll behaviour (probe lane-0 value {first})")


# ----------------------- one-time host-side weight prep ----------------------
def prepare_params(params):
    """Run ONCE, off the per-call path: gate reorder [i,f,g,o]->[i,f,o,g],
    transposes, bias fusion, 0.5 pre-scale of i/f/o (tanh trick), embedding x
    W_ih fusion, and zero-padding everything to full (sublane, lane) tiles."""
    emb, w_ih, w_hh, b_ih, b_hh, w1, b1, w2, b2 = params
    H, G = HIDDEN_DIM, GATES

    perm = np.concatenate([np.arange(0, H), np.arange(H, 2 * H),
                           np.arange(3 * H, 4 * H), np.arange(2 * H, 3 * H)])
    gscale = np.ones((1, G), np.float32)
    gscale[:, :3 * H] = 0.5                     # sigmoid(x) = 0.5*(1 + tanh(x/2)); exact in fp32

    wih_t = jnp.transpose(w_ih[perm]) * gscale  # (E, 4H)
    whh_t = jnp.transpose(w_hh[perm]) * gscale  # (H, 4H)
    bias = (b_ih + b_hh)[:, perm] * gscale      # (1, 4H)

    # Fuse the embedding table with the loop-invariant input projection and the
    # bias; the kernel's one-hot matmul then yields z_t @ W_ih^T + b directly.
    emb_gates = jnp.zeros((VOCAB_PAD, G), jnp.float32)
    emb_gates = emb_gates.at[:VOCAB_SIZE].set(emb @ wih_t + bias)

    # Recurrent weight as a full (4H, 4H) tile; zero rows [H:] kill junk lanes.
    whh_big = jnp.zeros((G, G), jnp.float32).at[:H].set(whh_t)

    # FC head padded to lane width (extra rows/cols are zero -> numerically exact).
    w1_big = jnp.zeros((G, FC1_PAD), jnp.float32).at[:H, :w1.shape[0]].set(jnp.transpose(w1))
    b1_pad = jnp.zeros((1, FC1_PAD), jnp.float32).at[:, :b1.shape[1]].set(b1)
    w2_pad = jnp.zeros((FC1_PAD, OUTPUT_SIZE), jnp.float32).at[:w2.shape[1]].set(jnp.transpose(w2))

    return (emb_gates, whh_big, w1_big, b1_pad, w2_pad, b2.astype(jnp.float32))


def build_forward(T, B, roll_shifts):
    """Returns a jitted forward whose only dispatched op is the pallas_call."""
    vmem = pl.BlockSpec(memory_space=pltpu.MemorySpace.VMEM)
    call = pl.pallas_call(
        make_lstm_fc_kernel(T, B, HIDDEN_DIM, roll_shifts),
        out_shape=jax.ShapeDtypeStruct((B, OUTPUT_SIZE), jnp.float32),
        in_specs=[vmem] * 7,
        out_specs=vmem,
    )

    @jax.jit
    def forward(text, prepped):
        ids = text.reshape(T * B, 1).astype(jnp.int32)
        return call(ids, *prepped)

    return forward


# --------------------------- pure-JAX reference ------------------------------
def reference_forward(text, params):
    emb, w_ih, w_hh, b_ih, b_hh, w1, b1, w2, b2 = params
    T, B = text.shape
    H = HIDDEN_DIM
    z = emb[text]
    h = jnp.zeros((B, H), jnp.float32)
    c = jnp.zeros((B, H), jnp.float32)
    for t in range(T):
        gates = z[t] @ w_ih.T + h @ w_hh.T + b_ih[0] + b_hh[0]
        i = jax.nn.sigmoid(gates[:, 0 * H:1 * H])
        f = jax.nn.sigmoid(gates[:, 1 * H:2 * H])
        g = jnp.tanh(gates[:, 2 * H:3 * H])
        o = jax.nn.sigmoid(gates[:, 3 * H:4 * H])
        c = f * c + i * g
        h = o * jnp.tanh(c)
    out = jnp.tanh(h @ w1.T + b1[0])
    return out @ w2.T + b2[0]


# --------------------------------- main --------------------------------------
if __name__ == "__main__":
    key = jax.random.PRNGKey(0)
    ks = jax.random.split(key, 10)
    H, E = HIDDEN_DIM, EMBEDDING_DIM
    init = 1.0 / np.sqrt(H)

    # Deterministic parameter init (shapes follow nn.Embedding / nn.LSTM / nn.Linear)
    emb  = jax.random.normal(ks[0], (VOCAB_SIZE, E), jnp.float32)
    w_ih = jax.random.uniform(ks[1], (4 * H, E), jnp.float32, -init, init)
    w_hh = jax.random.uniform(ks[2], (4 * H, H), jnp.float32, -init, init)
    b_ih = jax.random.uniform(ks[3], (1, 4 * H), jnp.float32, -init, init)
    b_hh = jax.random.uniform(ks[4], (1, 4 * H), jnp.float32, -init, init)
    w1   = jax.random.uniform(ks[5], (10, H), jnp.float32, -init, init)
    b1   = jax.random.uniform(ks[6], (1, 10), jnp.float32, -init, init)
    w2   = jax.random.uniform(ks[7], (OUTPUT_SIZE, 10), jnp.float32, -init, init)
    b2   = jax.random.uniform(ks[8], (1, OUTPUT_SIZE), jnp.float32, -init, init)
    params = (emb, w_ih, w_hh, b_ih, b_hh, w1, b1, w2, b2)

    text = jax.random.randint(ks[9], (SEQ_LEN, BATCH), 0, VOCAB_SIZE, jnp.int32)

    prepped = prepare_params(params)       # once, off the per-call path
    roll_shifts = probe_roll_shifts()      # once
    forward = build_forward(SEQ_LEN, BATCH, roll_shifts)

    out = forward(text, prepped)
    out = jax.block_until_ready(out)

    ref = reference_forward(text, params)
    np.testing.assert_allclose(np.asarray(out), np.asarray(ref), rtol=1e-5, atol=1e-5)

    print("KERNEL_OK")
</pallas_src>

<mosaic_0001>
module attributes {stable_mosaic.version = 11 : i64} {
  func.func @kern(%arg0: memref<8x128xf32, #tpu.memory_space<vmem>>, %arg1: memref<8x128xf32, #tpu.memory_space<vmem>>) attributes {dimension_semantics = [], scalar_prefetch = 0 : i64, scratch_operands = 0 : i64, tpu.core_type = #tpu.core_type<tc>} {
    %c0 = arith.constant 0 : index
    %c0_0 = arith.constant 0 : index
    %0 = vector.load %arg0[%c0, %c0_0] : memref<8x128xf32, #tpu.memory_space<vmem>>, vector<8x128xf32>
    %c32_i32 = arith.constant 32 : i32
    %1 = tpu.dynamic_rotate %0 by %c32_i32 dim 1 : vector<8x128xf32>, i32 -> vector<8x128xf32>
    %c0_1 = arith.constant 0 : index
    %c0_2 = arith.constant 0 : index
    %2 = vector.load %arg1[%c0_1, %c0_2] : memref<8x128xf32, #tpu.memory_space<vmem>>, vector<8x128xf32>
    tpu.vector_store %arg1[%c0_1, %c0_2], %1 {strides = array<i32>} : memref<8x128xf32, #tpu.memory_space<vmem>>, vector<8x128xf32>,
    return
  }
}

</mosaic_0001>

<bundles_post_ra>
// kernel: tpu_custom_call.1
= control target key start
LH: loop header
LB: loop body
LE: loop exit
PB: predicated region body
PF: predicated region fallthrough
CT: control target
= control target key end

     0   :  { %6 = vsyncpa [#allocation3], 0  ;;  %s118_s0 = inlined_call_operand.hbm [shape: f32[8,128], index: 0, kind: input, shape index: {}]   ;;  %s119_s1 = inlined_call_operand.hbm [shape: f32[8,128], index: 1, kind: output, shape index: {}]  }
   0x1   :  { %7 = vsyncpa [#allocation4], 0  ;;  %s13_s8 = sshll.u32 %s118_s0, 4  ;;  %s99_s9 = smov [#allocation2]   ;;  %s14_s8 = int_to_ptr.hbm [resolvable:$true] %s13_s8 }
   0x2   :  { %s15_s10 = sshll.u32 %s99_s9, 4  ;;  %s16_s10 = int_to_ptr.vmem [resolvable:$true] %s15_s10 }
   0x3   :  { %18 = dma.hbm_to_vmem [thread:$0]  %s14_s8, 128, %s16_s10, [#allocation3]  }
   0x4   :  { %95 = dma.done.wait [#allocation3], 128  }
   0x5   :  { %96 = vsyncadd [#allocation3], 4294967168  ;;  %v23_v0 = vld [vmem:[#allocation2] sm:$0xff]  ;;  %s100_s11 = smov 32   ;;  %s101_s12 = smov [#allocation5]  }
   0x6   :  { %24 = vrot.lane.b32.xlu0 %v23_v0, %s100_s11  ;;  %s32_s13 = sshll.u32 %s101_s12, 4  ;;  %s34_s16 = sshll.u32 %s119_s1, 4  ;;  %s33_s13 = int_to_ptr.vmem [resolvable:$true] %s32_s13  ;;  %s35_s16 = int_to_ptr.hbm [resolvable:$true] %s34_s16 }
  0x78   :  { %v25_v1 = vpop.permute.xlu0 %24 }
  0x79   :  { %26 = vst [vmem:[#allocation5] sm:$0xff] %v25_v1 }
  0x7a   :  { %37 = dma.vmem_to_hbm [thread:$0]  %s33_s13, 128, %s35_s16, [#allocation4]  }
  0x7b   :  { %97 = dma.done.wait [#allocation4], 128  }
  0x7c   :  { %98 = vsyncadd [#allocation4], 4294967168 }
  0x7d   :  { %42 = vsyncpa [#allocation3], 1 }
  0x7e   :  { %43 = vsyncpa [#allocation4], 1 }

</bundles_post_ra>
